<compile_context>
chip_gen: v7x
topology: tpu7x:2x2x1
jax: 0.10.0
libtpu: 0.0.40
codegen_flags: <defaults>
</compile_context>

<pallas_src>
import math

import jax
import jax.numpy as jnp
from jax.experimental import pallas as pl
from jax.experimental.pallas import tpu as pltpu


# ----------------------------------------------------------------------------
# Kernel: one MXU pass producing a lane-dense (B, tn) tile of the fused
# [main | b] output.  No bias stream, no accumulator scratch (K = C fits in a
# single dot).
# ----------------------------------------------------------------------------
def layer_matmul_kernel(c_ref, w_ref, out_ref):
    # c_ref:   (B, C)   resident across the whole grid
    # w_ref:   (C, tn)  streaming weight tile (dominant HBM stream)
    # out_ref: (B, tn)  lane-dense output tile, f32
    out_ref[...] = jnp.dot(c_ref[...], w_ref[...],
                           preferred_element_type=jnp.float32)


def _round_up(x, m):
    return ((x + m - 1) // m) * m


def _cdiv(a, b):
    return -(-a // b)


def _choose_tiling(n_total, c_size, dtype_bytes,
                   target_tile_bytes=512 * 1024, min_tiles=2):
    """Pick (tn, n_pad, grid_len) for the fused lane axis.

    tn is sized so one weight tile is ~target_tile_bytes of DMA (amortizes the
    ~0.35us per-grid-step overhead), padding waste beyond the mandatory
    128-lane rounding stays <10%, and -- when there is enough width -- the
    grid keeps at least `min_tiles` steps so the "parallel" axis can shard
    across both v7x TensorCores.
    """
    n_ceil = _round_up(n_total, 128)
    tn_target = max(
        128, ((target_tile_bytes // max(1, c_size * dtype_bytes)) // 128) * 128)
    g = _cdiv(n_ceil, tn_target)
    if n_ceil >= min_tiles * 128:
        g = max(g, min_tiles)
    while True:
        tn = _round_up(_cdiv(n_ceil, g), 128)
        n_pad = g * tn
        # Bound padding waste (beyond the unavoidable 128-lane rounding).
        if tn == 128 or (n_pad - n_ceil) * 10 <= n_ceil:
            return tn, n_pad, g
        g += 1


# ----------------------------------------------------------------------------
# One-time parameter preparation (hoisted out of the per-call path): fuse the
# two weights, cast to the streaming dtype, and pad the lane axis to the final
# tiled width.  The per-call path does NO concat / pad / cast of weights.
# ----------------------------------------------------------------------------
def prepare_layer_params(wm_t, wb_t, bias_b, in_size, out_size, *,
                         weight_dtype=jnp.bfloat16,
                         target_tile_bytes=512 * 1024):
    c_size = wm_t.shape[0]
    flat = in_size * out_size
    n_total = flat + out_size
    dtype_bytes = jnp.dtype(weight_dtype).itemsize
    tn, n_pad, _ = _choose_tiling(n_total, c_size, dtype_bytes,
                                  target_tile_bytes)

    w_fused = jnp.concatenate([wm_t, wb_t], axis=1).astype(weight_dtype)
    if n_pad != n_total:
        w_fused = jnp.pad(w_fused, ((0, 0), (0, n_pad - n_total)))

    return {
        "w_fused": w_fused,                    # (C, n_pad), weight_dtype
        "bias_b": bias_b.astype(jnp.float32),  # (1, out_size)
        "in_size": in_size,
        "out_size": out_size,
        "flat": flat,
        "n_total": n_total,
        "n_pad": n_pad,
        "tn": tn,
    }


def layer_forward(c, params, *, weight_buffers=2):
    """Pallas equivalent of Layer.forward.

    c: (B, C) activations.  Returns (w, b) with shapes
    (B, in_size, out_size) and (B, 1, out_size), both float32.
    """
    w_fused = params["w_fused"]
    tn, n_pad = params["tn"], params["n_pad"]
    flat, n_total = params["flat"], params["n_total"]
    B, C = c.shape

    # Tiny activation: feed it in the weight dtype so the MXU takes its native
    # bf16 path; accumulation stays f32 inside the kernel.
    c_in = c.astype(w_fused.dtype)

    grid = (n_pad // tn,)
    itemsize = jnp.dtype(w_fused.dtype).itemsize
    cost = pl.CostEstimate(
        flops=2 * B * C * n_pad,
        transcendentals=0,
        bytes_accessed=itemsize * (B * C + C * n_pad) + 4 * B * n_pad,
    )

    w_spec = pl.BlockSpec((C, tn), lambda j: (0, j))
    if weight_buffers > 2:
        # Opt-in deeper prefetch if profiling shows exposed weight DMA.
        w_spec = pl.BlockSpec((C, tn), lambda j: (0, j),
                              pipeline_mode=pl.Buffered(weight_buffers))

    out = pl.pallas_call(
        layer_matmul_kernel,
        out_shape=jax.ShapeDtypeStruct((B, n_pad), jnp.float32),
        grid=grid,
        in_specs=[
            pl.BlockSpec((B, C), lambda j: (0, 0)),   # c stays resident
            w_spec,                                   # weight tiles stream
        ],
        out_specs=pl.BlockSpec((B, tn), lambda j: (0, j)),
        compiler_params=pltpu.CompilerParams(
            dimension_semantics=("parallel",),        # megacore-shardable
            # default scoped VMEM limit is ample; don't request the whole chip
        ),
        cost_estimate=cost,
    )(c_in, w_fused)

    # Wrapper-side glue: the PyTorch .view()s and the tiny `b` bias add.
    w = out[:, :flat].reshape(B, params["in_size"], params["out_size"])
    b = (out[:, flat:n_total] + params["bias_b"]).reshape(
        B, 1, params["out_size"])
    return w, b


def init_params(key, c_size, in_size, out_size):
    """Deterministic init mimicking nn.Linear default (uniform +/- 1/sqrt(fan_in)).

    Weights are kept pre-transposed as (in_features, out_features) so the
    kernel computes y = c @ W directly.
    """
    k1, k2, k3 = jax.random.split(key, 3)
    bound = 1.0 / math.sqrt(c_size)
    wm_t = jax.random.uniform(
        k1, (c_size, in_size * out_size), jnp.float32, -bound, bound)
    wb_t = jax.random.uniform(
        k2, (c_size, out_size), jnp.float32, -bound, bound)
    bias_b = jax.random.uniform(
        k3, (1, out_size), jnp.float32, -bound, bound)
    return wm_t, wb_t, bias_b


if __name__ == "__main__":
    # Small shapes consistent with the module's forward.
    B, c_size, in_size, out_size = 2, 32, 8, 16
    # TODO(synk): if production B stays this tiny, stack independent batches
    # along B so the output block has >=8 sublane rows.

    key = jax.random.PRNGKey(0)
    k_c, k_p = jax.random.split(key)
    c = jax.random.normal(k_c, (B, c_size), jnp.float32)
    wm_t, wb_t, bias_b = init_params(k_p, c_size, in_size, out_size)

    # One-time fusion / padding / bf16 cast of the parameters.
    params = prepare_layer_params(wm_t, wb_t, bias_b, in_size, out_size)

    # Per-call path: only the Pallas matmul + tiny wrapper glue.
    fwd = jax.jit(lambda x: layer_forward(x, params))
    w, b = fwd(c)
    jax.block_until_ready((w, b))

    # Reference (same math as the PyTorch module), evaluated on the same
    # bf16-rounded weights/activations the kernel consumes, f32 accumulation.
    c16 = c.astype(jnp.bfloat16).astype(jnp.float32)
    wm16 = wm_t.astype(jnp.bfloat16).astype(jnp.float32)
    wb16 = wb_t.astype(jnp.bfloat16).astype(jnp.float32)
    w_ref = (c16 @ wm16).reshape(B, in_size, out_size)
    b_ref = (c16 @ wb16 + bias_b).reshape(B, 1, out_size)

    assert w.shape == (B, in_size, out_size)
    assert b.shape == (B, 1, out_size)
    assert jnp.allclose(w, w_ref, atol=1e-4, rtol=1e-4)
    assert jnp.allclose(b, b_ref, atol=1e-4, rtol=1e-4)

    print("KERNEL_OK")
</pallas_src>

<mosaic_0001>
module attributes {stable_mosaic.version = 11 : i64} {
  func.func @layer_matmul_kernel(%arg0: i32, %arg1: memref<2x32xbf16, #tpu.memory_space<vmem>>, %arg2: memref<32x128xbf16, #tpu.memory_space<vmem>>, %arg3: memref<2x128xf32, #tpu.memory_space<vmem>>) attributes {dimension_semantics = [#tpu.dimension_semantics<parallel>], iteration_bounds = array<i64: 2>, scalar_prefetch = 0 : i64, scratch_operands = 0 : i64, tpu.core_type = #tpu.core_type<tc>, window_params = [{pipeline_mode = #tpu.pipeline_mode<synchronous>, transform_indices = @transform_0, window_bounds = array<i64: 2, 32>}, {transform_indices = @transform_1, window_bounds = array<i64: 32, 128>}, {transform_indices = @transform_2, window_bounds = array<i64: 2, 128>}]} {
    %c0 = arith.constant 0 : index
    %c0_0 = arith.constant 0 : index
    %0 = vector.load %arg1[%c0, %c0_0] : memref<2x32xbf16, #tpu.memory_space<vmem>>, vector<2x32xbf16>
    %c0_1 = arith.constant 0 : index
    %c0_2 = arith.constant 0 : index
    %1 = vector.load %arg2[%c0_1, %c0_2] : memref<32x128xbf16, #tpu.memory_space<vmem>>, vector<32x128xbf16>
    %cst = arith.constant dense<0.000000e+00> : vector<2x128xf32>
    %2 = tpu.matmul %0, %1, %cst {dimension_numbers = #tpu.dot_dimension_numbers<[1], [0], [0], [1], [0, 0, 1, 1], [], []>} : vector<2x32xbf16>, vector<32x128xbf16>, vector<2x128xf32> -> vector<2x128xf32>
    %c0_3 = arith.constant 0 : index
    %c0_4 = arith.constant 0 : index
    %3 = vector.load %arg3[%c0_3, %c0_4] : memref<2x128xf32, #tpu.memory_space<vmem>>, vector<2x128xf32>
    tpu.vector_store %arg3[%c0_3, %c0_4], %2 {strides = array<i32>} : memref<2x128xf32, #tpu.memory_space<vmem>>, vector<2x128xf32>,
    return
  }
  func.func @transform_0(%arg0: i32) -> (i32, i32) {
    %c0_i32 = arith.constant 0 : i32
    %c0_i32_0 = arith.constant 0 : i32
    %c0_i32_1 = arith.constant 0 : i32
    return %c0_i32, %c0_i32_0 : i32, i32
  }
  func.func @transform_1(%arg0: i32) -> (i32, i32) {
    %c0_i32 = arith.constant 0 : i32
    %c0_i32_0 = arith.constant 0 : i32
    return %c0_i32, %arg0 : i32, i32
  }
  func.func @transform_2(%arg0: i32) -> (i32, i32) {
    %c0_i32 = arith.constant 0 : i32
    %c0_i32_0 = arith.constant 0 : i32
    return %c0_i32, %arg0 : i32, i32
  }
}

</mosaic_0001>

<bundles_post_ra>
// kernel: _lambda_.1
= control target key start
LH: loop header
LB: loop body
LE: loop exit
PB: predicated region body
PF: predicated region fallthrough
CT: control target
= control target key end

     0   :  { %s411_s9 = smov 0   ;;  %s413_s10 = smov 0   ;;  %s468_s0 = inlined_call_operand.vmem [shape: bf16[2,32], index: 0, kind: input, shape index: {}]   ;;  %s469_s1 = inlined_call_operand.vmem [shape: bf16[32,256], index: 1, kind: input, shape index: {}]   ;;  %s470_s2 = inlined_call_operand.vmem [shape: f32[2,256], index: 2, kind: output, shape index: {}]  }
   0x1   :  { %s415_s11 = smov 0  }
   0x2 LB: > { %s317_s12 = sadd.s32 4294967295, %s392_s11   ;;  %s428_s13 = sadd.s32 1, %s392_s11   ;;  %s392_s11 = sphi %s415_s11, %s473_s11   ;;  %s388_s10 = sphi %s413_s10, %s472_s10   ;;  %s384_s9 = sphi %s411_s9, %s471_s9  }
   0x3   : > { %s37_s14 = ssub.s32 %s392_s11, %s428_s13  ;;  %s40_s15 = sadd.s32 1, %s388_s10 }
   0x4   : > { %p38_p0 = scmp.eq.s32.totalorder %s37_s14, 0  ;;  %p47_p1 = scmp.ne.s32.totalorder %s388_s10, %s384_s9 }
   0x5   : > { %p48_p2 = scmp.eq.s32.totalorder %s392_s11, 0  ;;  %p320_p4 = scmp.ge.s32.totalorder %s392_s11, 2 }
   0x6   : > { %s437_s16 = scalar_select %p38_p0, %s388_s10, %s40_s15  }
   0x7   : > { %p49_p3 = por %p48_p2, %p47_p1  ;;  %102 = sbr.rel (%p320_p4) target bundleno = 21 (0x15), region = 20 }
   0xe   : > { %105 = sbr.rel (!%p49_p3) target bundleno = 21 (0x15), region = 24  ;;  %s107_s17 = sand.u32 (%p49_p3), 1, %s388_s10  }
   0xf   : > { %s322_s18 = sshll.u32 (%p49_p3), %s392_s11, 2  ;;  %s321_s19 = sshll.u32 (%p49_p3), %s107_s17, 4 }
  0x10   : > { %s111_s22 = scalar_lea.vmem (%p49_p3), %s469_s1, %s322_s18  ;;  %s109_s23 = scalar_lea.vmem (%p49_p3), [#allocation2], %s321_s19 }
  0x11   : > { %v127_v0 = vld [vmem:[%s111_s22] sm:$0xf] (%p49_p3)  ;;  %v129_v1 = vld [vmem:[%s111_s22 + $0x8] sm:$0xf] (%p49_p3)  ;;  %v131_v2 = vld [vmem:[%s111_s22 + $0x10] sm:$0xf] (%p49_p3) }
  0x12   : > { %128 = vst [vmem:[%s109_s23] sm:$0xf] (%p49_p3), %v127_v0  ;;  %130 = vst [vmem:[%s109_s23 + $0x4] sm:$0xf] (%p49_p3), %v129_v1  ;;  %v133_v3 = vld [vmem:[%s111_s22 + $0x18] sm:$0xf] (%p49_p3) }
  0x13   : > { %132 = vst [vmem:[%s109_s23 + $0x8] sm:$0xf] (%p49_p3), %v131_v2  ;;  %134 = vst [vmem:[%s109_s23 + $0xc] sm:$0xf] (%p49_p3), %v133_v3 }
  0x15 PF: > { %p323_p5 = scmp.ge.s32.totalorder %s392_s11, 1  ;;  %p164_p6 = scmp.lt.s32.totalorder %s392_s11, 3 }
  0x17   : > { %p165_p7 = pnand %p323_p5, %p164_p6 }
  0x18   : > { %s171_s24 = sand.u32 (!%p165_p7), 1, %s384_s9   ;;  %v394_v4 = vmov (!%p165_p7), 0.0   ;;  %vm395_vm0 = vmmov (!%p165_p7), 0   ;;  %v196_v7 = vld [vmem:[%s468_s0] sm:$0x1] (!%p165_p7)  ;;  %vm213_vm1 = vcmask (!%p165_p7), 261120  }
  0x19   : > { %168 = sbr.rel (%p165_p7) target bundleno = 250 (0xfa), region = 65  ;;  %334 = vmatprep.subr.bf16.mxu0 (!%p165_p7), %v394_v4  ;;  %s324_s25 = sshll.u32 (!%p165_p7), %s171_s24, 4  ;;  %338 = vmatprep.mubr.msk.bf16.mxu0 (!%p165_p7), %vm395_vm0, %v394_v4 }
  0x1a   : > { %s173_s26 = scalar_lea.vmem (!%p165_p7), [#allocation2], %s324_s25  ;;  %p191_p8 = scmp.lt.s32.totalorder (!%p165_p7), %s317_s12, 1 }
  0x1b   : > { %v368_v5 = vld [vmem:[%s173_s26] sm:$0xff] (!%p165_p7)   ;;  %v369_v6 = vld [vmem:[%s173_s26 + $0x8] sm:$0xff] (!%p165_p7)  }
  0x1c   : > { %335 = vmatpush3.bf16.msra.mxu0 (!%p165_p7), %v368_v5 }
  0x1d   : > { %336 = vmatprep.subr.bf16.mxu0 (!%p165_p7), %v394_v4 }
  0x20   : > { %337 = vmatpush3.bf16.msra.mxu0 %v369_v6  ;;  %s475_s12 = smov (!%p191_p8, %s317_s12), 1 }
  0x21   : > { %s325_s29 = sshll.u32 %s475_s12, 1 }
  0x22   : > { %s194_s4 = scalar_lea.vmem %s470_s2, %s325_s29 }
  0x23   : > { %339 = vmatmul.mubr.msk.bf16.vlgmr.msra.gmra.mrb[0].mxu0 %vm213_vm1, %v196_v7 }
  0xf6   : > { %v251_v8 = vpop.f32.mrb[0].mxu0 }
  0xf7   : > { %257 = vst [vmem:[%s194_s4] sm:$0x3] %v251_v8  ;;  %v340_v9 = vpop.f32.mrb[1].mxu0 }
  0xf8   : > { %v254_v10 = vpop.f32.mrb[2].mxu0 }
  0xf9   : > { %v341_v11 = vpop.f32.mrb[3].mxu0 }
  0xfa PF: > { %p9_p9 = scmp.ge.s32.totalorder %s428_s13, 4   ;;  %s471_s9 = smov %s388_s10 }
  0xfb   : > { %s472_s10 = smov %s437_s16  ;;  %s473_s11 = smov %s428_s13 }
  0xfc   :  { %11 = sbr.rel (!%p9_p9) target bundleno = 2 (0x2), region = 104 }

</bundles_post_ra>
